<compile_context>
chip_gen: v5e
topology: v5e:2x2
jax: 0.10.0
libtpu: 0.0.40
codegen_flags: <defaults>
</compile_context>

<pallas_src>
import functools
import math

import jax
import jax.numpy as jnp
from jax.experimental import pallas as pl
from jax.experimental.pallas import tpu as pltpu


# ----------------------------------------------------------------------------
# Kernel: out = x + pe, pe broadcast over the batch axis.
#   x_ref / o_ref : (ts, B * D)   sequence rows on sublanes, batch*d on lanes
#   pe_ref        : (ts, D)
# ----------------------------------------------------------------------------
def _pos_enc_kernel(x_ref, pe_ref, o_ref, *, batch: int, d_model: int):
    pe = pe_ref[...]
    if batch == 1:
        o_ref[...] = x_ref[...] + pe
    elif d_model % 128 == 0:
        # 128-aligned static lane slices: one dense (ts, D) add per batch
        # element; avoids materialising a (ts, B*D) pe temp in VMEM.
        for b in range(batch):
            sl = slice(b * d_model, (b + 1) * d_model)
            o_ref[:, sl] = x_ref[:, sl] + pe
    else:
        # Generic path: replicate pe across the lane axis (lane-dim concat is
        # cheap copy/shift work vs. the HBM-bound add).
        o_ref[...] = x_ref[...] + jnp.concatenate([pe] * batch, axis=-1)
    # TODO(synk): training-mode dropout (p=0.1) would draw a mask with
    # pltpu.prng_seed / pltpu.prng_random_bits here; eval forward is identity.


# ----------------------------------------------------------------------------
# Buffer construction — identical math to the PyTorch __init__.
# ----------------------------------------------------------------------------
def make_sinusoidal_pe(d_model: int, max_len: int = 5000,
                       dtype=jnp.float32) -> jnp.ndarray:
    assert d_model % 2 == 0, "d_model must be even for sin/cos interleaving"
    position = jnp.arange(max_len, dtype=jnp.float32)[:, None]          # (L, 1)
    div_term = jnp.exp(
        jnp.arange(0, d_model, 2, dtype=jnp.float32)
        * (-math.log(10000.0) / d_model))                                # (D/2,)
    angles = position * div_term                                         # (L, D/2)
    pe = jnp.zeros((max_len, d_model), dtype=jnp.float32)
    pe = pe.at[:, 0::2].set(jnp.sin(angles))
    pe = pe.at[:, 1::2].set(jnp.cos(angles))
    return pe.astype(dtype)                                              # (L, D)


# ----------------------------------------------------------------------------
# Tile selection: byte-budgeted, multiple-of-8 rows, >=2 tiles on big inputs.
# ----------------------------------------------------------------------------
def _choose_seq_tile(seq_len: int, row_bytes: int, target_block_bytes: int) -> int:
    ts = max(8, (target_block_bytes // max(row_bytes, 1)) // 8 * 8)
    if seq_len * row_bytes > (2 << 20):
        # Keep at least 2 sequence tiles so v7x's two TensorCores share work.
        half = ((seq_len + 1) // 2 + 7) // 8 * 8
        ts = min(ts, half)
    return seq_len if ts >= seq_len else ts


# ----------------------------------------------------------------------------
# Wrapper: one pallas_call, 1-D grid over byte-sized sequence tiles.
# ----------------------------------------------------------------------------
def positional_encoding_forward(x, pe, *, seq_tile=None,
                                target_block_bytes=4 * 1024 * 1024):
    """x: (S, B, D) time-major activations.  pe: (max_len, D) buffer."""
    S, B, D = x.shape
    max_len, d_pe = pe.shape
    assert d_pe == D, f"pe d_model {d_pe} != x d_model {D}"
    assert S <= max_len, f"sequence length {S} exceeds pe max_len {max_len}"

    itemsize = jnp.dtype(x.dtype).itemsize
    row_bytes = B * D * itemsize
    if seq_tile is not None:
        ts = min(int(seq_tile), S)
        if ts < S:
            ts = max(8, ts // 8 * 8)
    else:
        ts = _choose_seq_tile(S, row_bytes, target_block_bytes)
    num_tiles = pl.cdiv(S, ts)

    # (S, B, D) row-major -> (S, B*D): free reshape, sequence on sublanes.
    x2d = x.reshape(S, B * D)

    # pe stays the raw 2-D buffer; slice/cast only when the tile shape or the
    # dtype forces it (keeps the add single-dtype and skips a per-call copy).
    tile_ok_vs_full = (ts % 8 == 0) or (ts == max_len)
    if pe.dtype != x.dtype or not tile_ok_vs_full:
        pe_in = pe[:S].astype(x.dtype)
    else:
        pe_in = pe

    kernel = functools.partial(_pos_enc_kernel, batch=B, d_model=D)
    out2d = pl.pallas_call(
        kernel,
        out_shape=jax.ShapeDtypeStruct((S, B * D), x.dtype),
        grid=(num_tiles,),
        in_specs=[
            pl.BlockSpec((ts, B * D), lambda i: (i, 0)),
            pl.BlockSpec((ts, D), lambda i: (i, 0)),
        ],
        out_specs=pl.BlockSpec((ts, B * D), lambda i: (i, 0)),
        input_output_aliases={0: 0},      # pure in-place add: donate x buffer
        compiler_params=pltpu.CompilerParams(
            dimension_semantics=("parallel",),
            vmem_limit_bytes=32 * 1024 * 1024,
        ),
    )(x2d, pe_in)
    return out2d.reshape(S, B, D)


# ----------------------------------------------------------------------------
# Pure-JAX reference.
# ----------------------------------------------------------------------------
def ref_forward(x, pe):
    S = x.shape[0]
    return x + pe[:S].astype(x.dtype)[:, None, :]


# ----------------------------------------------------------------------------
if __name__ == "__main__":
    d_model, max_len = 128, 512
    pe = make_sinusoidal_pe(d_model, max_len)
    key = jax.random.PRNGKey(0)

    fwd = jax.jit(positional_encoding_forward, static_argnames=("seq_tile",))

    # 1) small single-tile case: (seq=8, batch=2, d_model=128), f32
    x1 = jax.random.normal(key, (8, 2, d_model), dtype=jnp.float32)
    o1 = jax.block_until_ready(fwd(x1, pe))
    r1 = ref_forward(x1, pe)
    assert o1.shape == x1.shape
    assert jnp.allclose(o1, r1, atol=1e-6, rtol=1e-6), (
        f"max abs diff {jnp.max(jnp.abs(o1 - r1))}")

    # 2) multi-tile grid with a ragged last tile (partial-block masking):
    #    seq=200, batch=2, forced 128-row tiles -> grid=(2,)
    x2 = jax.random.normal(jax.random.fold_in(key, 1), (200, 2, d_model),
                           dtype=jnp.float32)
    o2 = jax.block_until_ready(fwd(x2, pe, seq_tile=128))
    r2 = ref_forward(x2, pe)
    assert jnp.allclose(o2, r2, atol=1e-6, rtol=1e-6), (
        f"max abs diff {jnp.max(jnp.abs(o2 - r2))}")

    # 3) bf16 activations (pe cast to x.dtype in the wrapper, no mixed-dtype add)
    x3 = jax.random.normal(jax.random.fold_in(key, 2), (64, 4, d_model),
                           dtype=jnp.bfloat16)
    o3 = jax.block_until_ready(fwd(x3, pe))
    r3 = ref_forward(x3, pe)
    assert jnp.allclose(o3.astype(jnp.float32), r3.astype(jnp.float32),
                        atol=1e-2, rtol=1e-2)

    print("KERNEL_OK")
</pallas_src>

<mosaic_0001>
module attributes {stable_mosaic.version = 11 : i64} {
  func.func @_pos_enc_kernel(%arg0: i32, %arg1: memref<8x256xf32, #tpu.memory_space<vmem>>, %arg2: memref<8x128xf32, #tpu.memory_space<vmem>>, %arg3: memref<8x256xf32, #tpu.memory_space<vmem>>) attributes {dimension_semantics = [#tpu.dimension_semantics<parallel>], iteration_bounds = array<i64: 1>, scalar_prefetch = 0 : i64, scratch_operands = 0 : i64, tpu.core_type = #tpu.core_type<tc>, window_params = [{transform_indices = @transform_0, window_bounds = array<i64: 8, 256>}, {transform_indices = @transform_1, window_bounds = array<i64: 8, 128>}, {transform_indices = @transform_2, window_bounds = array<i64: 8, 256>}]} {
    %c0 = arith.constant 0 : index
    %c0_0 = arith.constant 0 : index
    %0 = vector.load %arg2[%c0, %c0_0] : memref<8x128xf32, #tpu.memory_space<vmem>>, vector<8x128xf32>
    %c0_1 = arith.constant 0 : index
    %c0_2 = arith.constant 0 : index
    %1 = vector.load %arg1[%c0_1, %c0_2] : memref<8x256xf32, #tpu.memory_space<vmem>>, vector<8x128xf32>
    %2 = arith.addf %1, %0 : vector<8x128xf32>
    %c0_3 = arith.constant 0 : index
    %c0_4 = arith.constant 0 : index
    %3 = vector.load %arg3[%c0_3, %c0_4] : memref<8x256xf32, #tpu.memory_space<vmem>>, vector<8x128xf32>
    tpu.vector_store %arg3[%c0_3, %c0_4], %2 {strides = array<i32>} : memref<8x256xf32, #tpu.memory_space<vmem>>, vector<8x128xf32>,
    %c0_5 = arith.constant 0 : index
    %c128 = arith.constant 128 : index
    %4 = vector.load %arg1[%c0_5, %c128] : memref<8x256xf32, #tpu.memory_space<vmem>>, vector<8x128xf32>
    %5 = arith.addf %4, %0 : vector<8x128xf32>
    %c0_6 = arith.constant 0 : index
    %c128_7 = arith.constant 128 : index
    %6 = vector.load %arg3[%c0_6, %c128_7] : memref<8x256xf32, #tpu.memory_space<vmem>>, vector<8x128xf32>
    tpu.vector_store %arg3[%c0_6, %c128_7], %5 {strides = array<i32>} : memref<8x256xf32, #tpu.memory_space<vmem>>, vector<8x128xf32>,
    return
  }
  func.func @transform_0(%arg0: i32) -> (i32, i32) {
    %c0_i32 = arith.constant 0 : i32
    %c0_i32_0 = arith.constant 0 : i32
    return %arg0, %c0_i32 : i32, i32
  }
  func.func @transform_1(%arg0: i32) -> (i32, i32) {
    %c0_i32 = arith.constant 0 : i32
    %c0_i32_0 = arith.constant 0 : i32
    return %arg0, %c0_i32 : i32, i32
  }
  func.func @transform_2(%arg0: i32) -> (i32, i32) {
    %c0_i32 = arith.constant 0 : i32
    %c0_i32_0 = arith.constant 0 : i32
    return %arg0, %c0_i32 : i32, i32
  }
}

</mosaic_0001>

<bundles_post_ra>
// kernel: positional_encoding_forward.1
= control target key start
LH: loop header
LB: loop body
LE: loop exit
PB: predicated region body
PF: predicated region fallthrough
CT: control target
= control target key end

     0   :  { %7 = vsyncpa [#allocation3], 0  ;;  %s64_s12 = smov [#allocation2]   ;;  %s95_s0 = inlined_call_operand.vmem [shape: f32[8,256], index: 0, kind: input, shape index: {}, may-alias: {0,2}]   ;;  %s96_s1 = inlined_call_operand.hbm [shape: f32[512,128], index: 1, kind: input, shape index: {}]   ;;  %s97_s2 = inlined_call_operand.vmem [shape: f32[8,256], index: 2, kind: output, shape index: {}, may-alias: {0,2}]  }
   0x1   :  { %s15_s11 = sshll.u32 %s96_s1, 4  ;;  %s17_s13 = sshll.u32 %s64_s12, 4  ;;  %s16_s11 = int_to_ptr.hbm [resolvable:$true] %s15_s11  ;;  %s18_s13 = int_to_ptr.vmem [resolvable:$true] %s17_s13 }
   0x2   :  { %20 = dma.hbm_to_vmem [thread:$0]  %s16_s11, 128, %s18_s13, [#allocation3]  }
   0x3   :  { %62 = dma.done.wait [#allocation3], 128  }
   0x4   :  { %63 = vsyncadd [#allocation3], 4294967168  ;;  %v25_v0 = vld [vmem:[#allocation2] sm:$0xff]  ;;  %v29_v2 = vld [vmem:[%s95_s0 + $0x8] sm:$0xff] }
   0x5   :  { %v26_v1 = vld [vmem:[%s95_s0] sm:$0xff]  ;;  %v30_v4 = vadd.f32 %v29_v2, %v25_v0 }
   0x6   :  { %v27_v3 = vadd.f32 %v26_v1, %v25_v0 }
   0x7   :  { %31 = vst [vmem:[%s97_s2 + $0x8] sm:$0xff] %v30_v4 }
   0x8   :  { %28 = vst [vmem:[%s97_s2] sm:$0xff] %v27_v3 }
   0x9   :  { %36 = vsyncpa [#allocation3], 1 }

</bundles_post_ra>
